<compile_context>
chip_gen: v6e
topology: v6e:2x2x1
jax: 0.10.0
libtpu: 0.0.40
codegen_flags: <defaults>
</compile_context>

<pallas_src>
import functools

import jax
import jax.numpy as jnp
from jax.experimental import pallas as pl
from jax.experimental.pallas import tpu as pltpu

# ----------------------------- configuration -------------------------------
IN_CHANNELS = 4
EXPANSION_FACTOR = 6
CHANNELS = IN_CHANNELS * EXPANSION_FACTOR        # 24
OUT_CHANNELS = CHANNELS                          # required for residual add
N_INTERMEDIATE_LAYERS = 2                        # shared-weight repeats
BATCH = 2
SEQ = 8
LN_EPS = 1e-5

TM_MAX = 4096                                    # lane-tile upper bound


# ------------------------------- kernel ------------------------------------
def _inverted_residual_kernel(
    xT_ref,      # [Cin,  TM]   activations, channels on sublanes, M on lanes
    wcat_ref,    # [Ctot, Cin]  fused (entry | skip) weight, (out, in) layout
    bcat_ref,    # [Ctot, 1]    fused (entry | skip) bias
    w2k_ref,     # [Cexp, Cexp] collapsed intermediate stack (+ LN affine)
    b2k_ref,     # [Cexp, 1]
    o_ref,       # [Cout, TM]
    *,
    cexp: int,
    eps: float,
):
    x = xT_ref[...]                      # [Cin, TM]

    # Fused entry + skip projection on the MXU (was a VALU broadcast-FMA loop):
    #   y = Wcat @ x + bcat        -> [Ctot, TM]
    y = jnp.dot(wcat_ref[...], x, preferred_element_type=jnp.float32)
    y = y + bcat_ref[...]

    h = jnp.maximum(y[:cexp, :], 0.0)    # entry ReLU        [Cexp, TM]
    skip = y[cexp:, :]                   # skip Linear out   [Cout, TM]

    # LayerNorm over channels (sublane axis), two-pass (robust) form.
    # gamma/beta are folded into w2k/b2k by the wrapper.
    inv_c = 1.0 / cexp
    mean = jnp.sum(h, axis=0, keepdims=True) * inv_c
    centered = h - mean
    var = jnp.sum(centered * centered, axis=0, keepdims=True) * inv_c
    z = centered * jax.lax.rsqrt(var + eps)

    # Collapsed intermediate stack (W2^n with LN affine folded in): one matmul.
    g = jnp.dot(w2k_ref[...], z, preferred_element_type=jnp.float32)
    g = g + b2k_ref[...]

    o_ref[...] = (jnp.maximum(g, 0.0) + skip).astype(o_ref.dtype)


# --------------------------- parameter folding ------------------------------
def fold_params(params, n_intermediate_layers):
    """Fold the module's parameters into the kernel's fused, transposed form."""
    w1, b1, gamma, beta, w2, b2, ws, bs = params   # weights in (in, out) layout
    cin, cexp = w1.shape
    cout = ws.shape[1]

    # Collapse n applications of the SAME affine layer h -> h @ W2 + b2:
    #   h_n = h_0 @ W2^n + b2 @ (I + W2 + ... + W2^(n-1))
    # (rounding order differs slightly from sequential application; fine for
    #  small n / well-conditioned W2, which is the module's regime.)
    a_eff = jnp.eye(cexp, dtype=jnp.float32)
    a_sum = jnp.zeros((cexp, cexp), jnp.float32)
    for _ in range(n_intermediate_layers):
        a_sum = a_sum + a_eff
        a_eff = a_eff @ w2
    b2_eff = b2 @ a_sum                                   # [1, Cexp]

    # Fold the LayerNorm affine: (z*gamma + beta) @ A + b
    #   = z @ (gamma[:,None]*A) + (beta @ A + b)
    w_fold = gamma.reshape(cexp, 1) * a_eff               # [Cexp_in, Cexp_out]
    b_fold = beta @ a_eff + b2_eff                        # [1, Cexp_out]

    # Transposed (column-activation) kernel parameters.
    w2k = w_fold.T                                        # [Cexp_out, Cexp_in]
    b2k = b_fold.reshape(cexp, 1)
    wcat = jnp.concatenate([w1.T, ws.T], axis=0)          # [Cexp+Cout, Cin]
    bcat = jnp.concatenate([b1, bs], axis=1).reshape(cexp + cout, 1)
    return wcat, bcat, w2k, b2k


# ------------------------------ tile picking --------------------------------
def _pick_tiles(M):
    """Lane-tile size and count: big tiles, >=2 tiles for v7x, minimal pad."""
    m128 = max(128, pl.cdiv(M, 128) * 128)       # lane-aligned extent
    n_tiles = pl.cdiv(m128, TM_MAX)
    if n_tiles == 1 and m128 >= 256:
        n_tiles = 2                              # keep both v7x TCs busy
    tm = pl.cdiv(m128, n_tiles * 128) * 128      # <= TM_MAX, pad <= n_tiles*128
    m_pad = n_tiles * tm
    return tm, m_pad, n_tiles


# ------------------------------- wrapper ------------------------------------
def inverted_residual_block_1d(x, params, *, n_intermediate_layers):
    """x: [B, T, Cin] channel-last. Returns [B, T, Cout]."""
    B, T, cin = x.shape
    M = B * T

    wcat, bcat, w2k, b2k = fold_params(params, n_intermediate_layers)
    ctot = wcat.shape[0]
    cexp = w2k.shape[0]
    cout = ctot - cexp

    # Channel-major layout: M = batch*seq on the 128-lane axis (lane-dense
    # unmasked stores in the kernel). TODO(synk): carry this layout across
    # adjacent blocks to eliminate these wrapper transposes.
    xT = x.reshape(M, cin).T                              # [Cin, M]

    tm, m_pad, n_tiles = _pick_tiles(M)
    if m_pad != M:
        # Zero-padded columns flow through LayerNorm of a bias-only column;
        # rsqrt(var + eps) with eps > 0 keeps them finite, and they are
        # sliced off below. Columns never mix, so this is safe.
        xT = jnp.pad(xT, ((0, 0), (0, m_pad - M)))
    grid = (n_tiles,)

    outT = pl.pallas_call(
        functools.partial(_inverted_residual_kernel, cexp=cexp, eps=LN_EPS),
        out_shape=jax.ShapeDtypeStruct((cout, m_pad), x.dtype),
        grid=grid,
        in_specs=[
            pl.BlockSpec((cin, tm), lambda i: (0, i)),     # activations: tiled over M
            pl.BlockSpec((ctot, cin), lambda i: (0, 0)),   # params: constant index ->
            pl.BlockSpec((ctot, 1), lambda i: (0, 0)),     #   VMEM-resident across
            pl.BlockSpec((cexp, cexp), lambda i: (0, 0)),  #   grid steps (no re-DMA)
            pl.BlockSpec((cexp, 1), lambda i: (0, 0)),
        ],
        out_specs=pl.BlockSpec((cout, tm), lambda i: (0, i)),
        compiler_params=pltpu.CompilerParams(
            dimension_semantics=("parallel",),   # shards M across the 2 TCs on v7x
            vmem_limit_bytes=32 * 1024 * 1024,   # ~1 MiB actually needed; << 64 MiB
        ),
    )(xT, wcat, bcat, w2k, b2k)

    return outT[:, :M].T.reshape(B, T, cout)


# ------------------------- deterministic parameters -------------------------
def make_params(key):
    ks = jax.random.split(key, 6)
    scale_in = 1.0 / jnp.sqrt(IN_CHANNELS)
    scale_exp = 1.0 / jnp.sqrt(CHANNELS)
    w1 = jax.random.uniform(ks[0], (IN_CHANNELS, CHANNELS), jnp.float32,
                            -scale_in, scale_in)
    b1 = jax.random.uniform(ks[1], (1, CHANNELS), jnp.float32,
                            -scale_in, scale_in)
    gamma = jnp.ones((1, CHANNELS), jnp.float32)
    beta = jnp.zeros((1, CHANNELS), jnp.float32)
    w2 = jax.random.uniform(ks[2], (CHANNELS, CHANNELS), jnp.float32,
                            -scale_exp, scale_exp)
    b2 = jax.random.uniform(ks[3], (1, CHANNELS), jnp.float32,
                            -scale_exp, scale_exp)
    ws = jax.random.uniform(ks[4], (IN_CHANNELS, OUT_CHANNELS), jnp.float32,
                            -scale_in, scale_in)
    bs = jax.random.uniform(ks[5], (1, OUT_CHANNELS), jnp.float32,
                            -scale_in, scale_in)
    return (w1, b1, gamma, beta, w2, b2, ws, bs)


# ----------------------------- pure-JAX reference ----------------------------
def reference(x, params, *, n_intermediate_layers):
    w1, b1, gamma, beta, w2, b2, ws, bs = params
    residual = x
    h = jnp.maximum(x @ w1 + b1, 0.0)
    mean = jnp.mean(h, axis=-1, keepdims=True)
    var = jnp.mean((h - mean) ** 2, axis=-1, keepdims=True)
    h = (h - mean) / jnp.sqrt(var + LN_EPS) * gamma + beta
    for _ in range(n_intermediate_layers):
        h = h @ w2 + b2
    h = jnp.maximum(h, 0.0)
    return h + (residual @ ws + bs)


# ---------------------------------- main ------------------------------------
if __name__ == "__main__":
    key = jax.random.PRNGKey(0)
    k_x, k_p = jax.random.split(key)
    x = jax.random.normal(k_x, (BATCH, SEQ, IN_CHANNELS), jnp.float32)
    params = make_params(k_p)

    out = inverted_residual_block_1d(
        x, params, n_intermediate_layers=N_INTERMEDIATE_LAYERS
    )
    out = jax.block_until_ready(out)

    ref = reference(x, params, n_intermediate_layers=N_INTERMEDIATE_LAYERS)
    assert out.shape == (BATCH, SEQ, OUT_CHANNELS)
    assert jnp.allclose(out, ref, atol=1e-4, rtol=1e-4), "mismatch vs reference"

    print("KERNEL_OK")
</pallas_src>

<mosaic_0001>
module attributes {stable_mosaic.version = 11 : i64} {
  func.func @_inverted_residual_kernel(%arg0: i32, %arg1: memref<4x128xf32, #tpu.memory_space<vmem>>, %arg2: memref<48x4xf32, #tpu.memory_space<vmem>>, %arg3: memref<48x1xf32, #tpu.memory_space<vmem>>, %arg4: memref<24x24xf32, #tpu.memory_space<vmem>>, %arg5: memref<24x1xf32, #tpu.memory_space<vmem>>, %arg6: memref<24x128xf32, #tpu.memory_space<vmem>>) attributes {dimension_semantics = [#tpu.dimension_semantics<parallel>], iteration_bounds = array<i64: 1>, scalar_prefetch = 0 : i64, scratch_operands = 0 : i64, tpu.core_type = #tpu.core_type<tc>, window_params = [{transform_indices = @transform_0, window_bounds = array<i64: 4, 128>}, {pipeline_mode = #tpu.pipeline_mode<synchronous>, transform_indices = @transform_1, window_bounds = array<i64: 48, 4>}, {pipeline_mode = #tpu.pipeline_mode<synchronous>, transform_indices = @transform_2, window_bounds = array<i64: 48, 1>}, {pipeline_mode = #tpu.pipeline_mode<synchronous>, transform_indices = @transform_3, window_bounds = array<i64: 24, 24>}, {pipeline_mode = #tpu.pipeline_mode<synchronous>, transform_indices = @transform_4, window_bounds = array<i64: 24, 1>}, {transform_indices = @transform_5, window_bounds = array<i64: 24, 128>}]} {
    %c0 = arith.constant 0 : index
    %c0_0 = arith.constant 0 : index
    %0 = vector.load %arg1[%c0, %c0_0] : memref<4x128xf32, #tpu.memory_space<vmem>>, vector<4x128xf32>
    %c0_1 = arith.constant 0 : index
    %c0_2 = arith.constant 0 : index
    %1 = vector.load %arg2[%c0_1, %c0_2] : memref<48x4xf32, #tpu.memory_space<vmem>>, vector<48x4xf32>
    %cst = arith.constant dense<0.000000e+00> : vector<48x128xf32>
    %2 = tpu.matmul %1, %0, %cst {dimension_numbers = #tpu.dot_dimension_numbers<[1], [0], [0], [1], [0, 0, 1, 1], [], []>} : vector<48x4xf32>, vector<4x128xf32>, vector<48x128xf32> -> vector<48x128xf32>
    %c0_3 = arith.constant 0 : index
    %c0_4 = arith.constant 0 : index
    %3 = vector.load %arg3[%c0_3, %c0_4] : memref<48x1xf32, #tpu.memory_space<vmem>>, vector<48x1xf32>
    %4 = vector.broadcast %3 : vector<48x1xf32> to vector<48x128xf32>
    %5 = arith.addf %2, %4 : vector<48x128xf32>
    %6 = vector.extract_strided_slice %5 {offsets = [0, 0], sizes = [24, 128], strides = [1, 1]} : vector<48x128xf32> to vector<24x128xf32>
    %cst_5 = arith.constant 0.000000e+00 : f32
    %7 = vector.broadcast %cst_5 : f32 to vector<24x128xf32>
    %8 = arith.maximumf %6, %7 : vector<24x128xf32>
    %9 = vector.extract_strided_slice %5 {offsets = [24, 0], sizes = [24, 128], strides = [1, 1]} : vector<48x128xf32> to vector<24x128xf32>
    %cst_6 = arith.constant dense<0.000000e+00> : vector<128xf32>
    %10 = vector.multi_reduction <add>, %8, %cst_6 [0] : vector<24x128xf32> to vector<128xf32>
    %11 = vector.shape_cast %10 : vector<128xf32> to vector<1x128xf32>
    %cst_7 = arith.constant 0.0416666679 : f32
    %12 = vector.broadcast %cst_7 : f32 to vector<1x128xf32>
    %13 = arith.mulf %11, %12 : vector<1x128xf32>
    %14 = vector.broadcast %13 : vector<1x128xf32> to vector<24x128xf32>
    %15 = arith.subf %8, %14 : vector<24x128xf32>
    %16 = arith.mulf %15, %15 : vector<24x128xf32>
    %cst_8 = arith.constant dense<0.000000e+00> : vector<128xf32>
    %17 = vector.multi_reduction <add>, %16, %cst_8 [0] : vector<24x128xf32> to vector<128xf32>
    %18 = vector.shape_cast %17 : vector<128xf32> to vector<1x128xf32>
    %cst_9 = arith.constant 0.0416666679 : f32
    %19 = vector.broadcast %cst_9 : f32 to vector<1x128xf32>
    %20 = arith.mulf %18, %19 : vector<1x128xf32>
    %cst_10 = arith.constant 9.99999974E-6 : f32
    %21 = vector.broadcast %cst_10 : f32 to vector<1x128xf32>
    %22 = arith.addf %20, %21 : vector<1x128xf32>
    %23 = math.rsqrt %22 : vector<1x128xf32>
    %24 = vector.broadcast %23 : vector<1x128xf32> to vector<24x128xf32>
    %25 = arith.mulf %15, %24 : vector<24x128xf32>
    %c0_11 = arith.constant 0 : index
    %c0_12 = arith.constant 0 : index
    %26 = vector.load %arg4[%c0_11, %c0_12] : memref<24x24xf32, #tpu.memory_space<vmem>>, vector<24x24xf32>
    %cst_13 = arith.constant dense<0.000000e+00> : vector<24x128xf32>
    %27 = tpu.matmul %26, %25, %cst_13 {dimension_numbers = #tpu.dot_dimension_numbers<[1], [0], [0], [1], [0, 0, 1, 1], [], []>} : vector<24x24xf32>, vector<24x128xf32>, vector<24x128xf32> -> vector<24x128xf32>
    %c0_14 = arith.constant 0 : index
    %c0_15 = arith.constant 0 : index
    %28 = vector.load %arg5[%c0_14, %c0_15] : memref<24x1xf32, #tpu.memory_space<vmem>>, vector<24x1xf32>
    %29 = vector.broadcast %28 : vector<24x1xf32> to vector<24x128xf32>
    %30 = arith.addf %27, %29 : vector<24x128xf32>
    %cst_16 = arith.constant 0.000000e+00 : f32
    %31 = vector.broadcast %cst_16 : f32 to vector<24x128xf32>
    %32 = arith.maximumf %30, %31 : vector<24x128xf32>
    %33 = arith.addf %32, %9 : vector<24x128xf32>
    %c0_17 = arith.constant 0 : index
    %c0_18 = arith.constant 0 : index
    %34 = vector.load %arg6[%c0_17, %c0_18] : memref<24x128xf32, #tpu.memory_space<vmem>>, vector<24x128xf32>
    tpu.vector_store %arg6[%c0_17, %c0_18], %33 {strides = array<i32>} : memref<24x128xf32, #tpu.memory_space<vmem>>, vector<24x128xf32>,
    return
  }
  func.func @transform_0(%arg0: i32) -> (i32, i32) {
    %c0_i32 = arith.constant 0 : i32
    %c0_i32_0 = arith.constant 0 : i32
    return %c0_i32, %arg0 : i32, i32
  }
  func.func @transform_1(%arg0: i32) -> (i32, i32) {
    %c0_i32 = arith.constant 0 : i32
    %c0_i32_0 = arith.constant 0 : i32
    %c0_i32_1 = arith.constant 0 : i32
    return %c0_i32, %c0_i32_0 : i32, i32
  }
  func.func @transform_2(%arg0: i32) -> (i32, i32) {
    %c0_i32 = arith.constant 0 : i32
    %c0_i32_0 = arith.constant 0 : i32
    %c0_i32_1 = arith.constant 0 : i32
    return %c0_i32, %c0_i32_0 : i32, i32
  }
  func.func @transform_3(%arg0: i32) -> (i32, i32) {
    %c0_i32 = arith.constant 0 : i32
    %c0_i32_0 = arith.constant 0 : i32
    %c0_i32_1 = arith.constant 0 : i32
    return %c0_i32, %c0_i32_0 : i32, i32
  }
  func.func @transform_4(%arg0: i32) -> (i32, i32) {
    %c0_i32 = arith.constant 0 : i32
    %c0_i32_0 = arith.constant 0 : i32
    %c0_i32_1 = arith.constant 0 : i32
    return %c0_i32, %c0_i32_0 : i32, i32
  }
  func.func @transform_5(%arg0: i32) -> (i32, i32) {
    %c0_i32 = arith.constant 0 : i32
    %c0_i32_0 = arith.constant 0 : i32
    return %c0_i32, %arg0 : i32, i32
  }
}

</mosaic_0001>

<bundles_post_ra>
// kernel: tpu_custom_call.1
= control target key start
LH: loop header
LB: loop body
LE: loop exit
PB: predicated region body
PF: predicated region fallthrough
CT: control target
= control target key end

     0   :  { %vm83_vm0 = vcmask 1043456   ;;  %vm64_vm1 = vcmask 31744   ;;  %v431_v4 = vmov 0   ;;  %s536_s0 = inlined_call_operand.vmem [shape: f32[4,128], index: 0, kind: input, shape index: {}]   ;;  %s537_s1 = inlined_call_operand.vmem [shape: f32[48,4], index: 1, kind: input, shape index: {}]   ;;  %s538_s2 = inlined_call_operand.vmem [shape: f32[48,1], index: 2, kind: input, shape index: {}]   ;;  %s539_s3 = inlined_call_operand.vmem [shape: f32[24,24], index: 3, kind: input, shape index: {}]   ;;  %s540_s4 = inlined_call_operand.vmem [shape: f32[24,1], index: 4, kind: input, shape index: {}]   ;;  %s541_s5 = inlined_call_operand.hbm [shape: f32[24,128], index: 5, kind: output, shape index: {}]  }
   0x1   :  { %v21_v0 = vld [vmem:[%s536_s0] sm:$0xf]  ;;  %v23_v2 = vld [vmem:[%s537_s1 + $0x8] sm:$0xff]  ;;  %v24_v3 = vld [vmem:[%s537_s1 + $0x10] sm:$0xff]  ;;  %405 = vset.pattern.permute.xlu0 %v431_v4  ;;  %406 = vset.pattern.permute.xlu1 %v431_v4 }
   0x2   :  { %v22_v1 = vld [vmem:[%s537_s1] sm:$0xff]  ;;  %373 = vmatprep.subr.msk.mxu0 %vm83_vm0, %v21_v0  ;;  %v30_v6 = vld [vmem:[%s538_s2 + $0x10] sm:$0xff]  ;;  %v25_v7 = vld [vmem:[%s537_s1 + $0x18] sm:$0xff] }
   0x3   :  { %375 = vmatprep.mubr.msk.f32.mxu0 %vm64_vm1, %v22_v1  ;;  %374 = vmatpush3.msk.msra.mxu0 %vm83_vm0, %v21_v0  ;;  %v28_v5 = vld [vmem:[%s538_s2] sm:$0xff]  ;;  %v29_v8 = vld [vmem:[%s538_s2 + $0x8] sm:$0xff] }
   0x4   :  { %376 = vmatmul.mubr.msk.f32.vlgmr.msra.gmra.mxu0 %vm64_vm1, %v23_v2  ;;  %36 = vperm.xlu0 %405, %v28_v5   ;;  %v26_v9 = vld [vmem:[%s537_s1 + $0x20] sm:$0xff] }
   0x5   :  { %378 = vmatprep.mubr.msk.f32.mxu0 %vm64_vm1, %v24_v3  ;;  %46 = vperm.xlu1 %406, %v30_v6  }
   0x6   :  { %10 = vsyncpa [#allocation3], 0  ;;  %v217_v10 = vld [vmem:[%s540_s4] sm:$0xff]  ;;  %v27_v11 = vld [vmem:[%s537_s1 + $0x28] sm:$0xff]  ;;  %v432_v17 = vmov 0.0   ;;  %vm433_vm2 = vmmov 0  }
   0x7   :  { %v218_v12 = vld [vmem:[%s540_s4 + $0x8] sm:$0xff]  ;;  %v219_v13 = vld [vmem:[%s540_s4 + $0x10] sm:$0xff]  ;;  %v31_v14 = vld [vmem:[%s538_s2 + $0x18] sm:$0xff]  ;;  %384 = vmatprep.subr.mxu1 %v432_v17  ;;  %390 = vmatprep.mubr.msk.f32.mxu1 %vm433_vm2, %v432_v17  ;;  %vm235_vm3 = vcmask 195584  }
   0x8   :  { %379 = vmatmul.mubr.msk.f32.gmra.mxu0 %vm64_vm1, %v25_v7  ;;  %41 = vperm.xlu0 %405, %v29_v8   ;;  %v32_v15 = vld [vmem:[%s538_s2 + $0x20] sm:$0xff]  ;;  %v33_v16 = vld [vmem:[%s538_s2 + $0x28] sm:$0xff]  ;;  %v216_v62 = vld [vmem:[%s539_s3 + $0x10] sm:$0xff] }
   0x9   :  { %381 = vmatprep.mubr.msk.f32.mxu0 %vm64_vm1, %v26_v9  ;;  %222 = vperm.xlu1 %406, %v217_v10   ;;  %v214_v60 = vld [vmem:[%s539_s3] sm:$0xff]  ;;  %v215_v61 = vld [vmem:[%s539_s3 + $0x8] sm:$0xff]  ;;  %s434_s3 = smov [#allocation2]  }
   0xa   :  { %s339_s26 = sshll.u32 %s434_s3, 4  ;;  %s340_s26 = int_to_ptr.vmem [resolvable:$true] %s339_s26 }
   0xb   :  { %s409_s27 = scalar_lea.vmem %s340_s26, 384  ;;  %p414_p1 = scmp.lt.s32.totalorder %s340_s26, %s340_s26 }
   0xc   :  { %382 = vmatmul.mubr.msk.f32.gmra.mxu0 %vm64_vm1, %v27_v11  ;;  %227 = vperm.xlu0 %405, %v218_v12   ;;  %p410_p0 = scmp.ne.s32.totalorder %s340_s26, %s409_s27  ;;  %p415_p2 = scmp.lt.s32.totalorder %s409_s27, %s409_s27 }
   0xd   :  { %232 = vperm.xlu1 %406, %v219_v13  }
   0xe   :  { %p416_p3 = por %p415_p2, %p414_p1 }
  0x10   :  { %51 = vperm.xlu0 %405, %v31_v14   ;;  %p417_p4 = pnand %p416_p3, %p410_p0 }
  0x11   :  { %56 = vperm.xlu1 %406, %v32_v15  }
  0x14   :  { %61 = vperm.xlu0 %405, %v33_v16  }
  0x7f   :  { %v37_v18 = vpop.permute.xlu0 %36 }
  0x80   :  { %v47_v26 = vpop.permute.xlu1 %46 }
  0x83   :  { %v42_v20 = vpop.permute.xlu0 %41 }
  0x84   :  { %v223_v63 = vpop.permute.xlu1 %222 }
  0x87   :  { %v228_v0 = vpop.permute.xlu0 %227 }
  0x88   :  { %v233_v1 = vpop.permute.xlu1 %232 }
  0x8b   :  { %v52_v5 = vpop.permute.xlu0 %51 }
  0x8c   :  { %v57_v13 = vpop.permute.xlu1 %56 }
  0xc4   :  { %v377_v19 = vpop.f32.mrf.mxu0 }
  0xc5   :  { %v159_v22 = vadd.f32 %v377_v19, %v42_v20  ;;  %v62_v20 = vpop.permute.xlu0 %61 }
  0xc6   :  { %v153_v21 = vpop.f32.mrf.mxu0 }
  0xc7   :  { %v154_v23 = vadd.f32 %v153_v21, %v37_v18  ;;  %v183_v28 = vmax.f32 %v159_v22, 0.0 }
  0xc8   :  { %v380_v24 = vpop.f32.mrf.mxu0 }
  0xc9   :  { %v182_v25 = vmax.f32 %v154_v23, 0.0  ;;  %v169_v7 = vadd.f32 %v380_v24, %v52_v5 }
  0xca   :  { %v163_v27 = vpop.f32.mrf.mxu0 }
  0xcb   :  { %v164_v29 = vadd.f32 %v163_v27, %v47_v26  ;;  %v185_v30 = vadd.f32 %v183_v28, %v182_v25 }
  0xcc   :  { %v383_v2 = vpop.f32.mrf.mxu0 }
  0xcd   :  { %v184_v31 = vmax.f32 %v164_v29, 0.0  ;;  %v179_v22 = vadd.f32 %v383_v2, %v62_v20 }
  0xce   :  { %v173_v9 = vpop.f32.mrf.mxu0 }
  0xcf   :  { %v186_v32 = vadd.f32 %v185_v30, %v184_v31  ;;  %v174_v15 = vadd.f32 %v173_v9, %v57_v13 }
  0xd1   :  { %v187_v33 = vrot.slane %v186_v32, 4 }
  0xd3   :  { %v188_v34 = vadd.f32 %v187_v33, %v186_v32 }
  0xd5   :  { %v189_v35 = vrot.slane %v188_v34, 2 }
  0xd7   :  { %v190_v36 = vadd.f32 %v189_v35, %v188_v34 }
  0xd9   :  { %v191_v37 = vrot.slane %v190_v36, 1 }
  0xdb   :  { %v192_v38 = vadd.f32 %v191_v37, %v190_v36 }
  0xdd   :  { %v193_v39 = vmul.f32 0.041666668, %v192_v38 }
  0xdf   :  { %v194_v40 = vsub.f32 %v182_v25, %v193_v39  ;;  %v195_v41 = vsub.f32 %v183_v28, %v193_v39  ;;  %v196_v42 = vsub.f32 %v184_v31, %v193_v39 }
  0xe1   :  { %v197_v43 = vmul.f32 %v194_v40, %v194_v40  ;;  %v198_v44 = vmul.f32 %v195_v41, %v195_v41  ;;  %v199_v45 = vmul.f32 %v196_v42, %v196_v42 }
  0xe3   :  { %v200_v46 = vadd.f32 %v198_v44, %v197_v43 }
  0xe5   :  { %v201_v47 = vadd.f32 %v200_v46, %v199_v45 }
  0xe7   :  { %v202_v48 = vrot.slane %v201_v47, 4 }
  0xe9   :  { %v203_v49 = vadd.f32 %v202_v48, %v201_v47 }
  0xeb   :  { %v204_v50 = vrot.slane %v203_v49, 2 }
  0xed   :  { %v205_v51 = vadd.f32 %v204_v50, %v203_v49 }
  0xef   :  { %v206_v52 = vrot.slane %v205_v51, 1 }
  0xf1   :  { %v207_v53 = vadd.f32 %v206_v52, %v205_v51 }
  0xf3   :  { %v208_v54 = vmul.f32 0.041666668, %v207_v53 }
  0xf5   :  { %v209_v55 = vadd.f32 1e-05, %v208_v54 }
  0xf7   :  { %407 = vrsqrt.f32 %v209_v55 }
 0x104   :  { %v408_v56 = vpop.eup %407 }
 0x105   :  { %v213_v57 = vmul.f32 %v408_v56, %v196_v42  ;;  %v212_v58 = vmul.f32 %v408_v56, %v195_v41  ;;  %v211_v59 = vmul.f32 %v408_v56, %v194_v40 }
 0x107   :  { %385 = vmatpush3.msra.mxu1 %v213_v57 }
 0x108   :  { %386 = vmatprep.subr.mxu1 %v432_v17 }
 0x109   :  { %387 = vmatpush3.msra.mxu1 %v212_v58 }
 0x10a   :  { %388 = vmatprep.subr.mxu1 %v432_v17 }
 0x10b   :  { %389 = vmatpush3.msra.mxu1 %v211_v59 }
 0x10c   :  { %391 = vmatmul.mubr.msk.f32.vlgmr.msra.gmra.mxu1 %vm235_vm3, %v214_v60 }
 0x10d   :  { %393 = vmatprep.mubr.msk.f32.mxu1 %vm433_vm2, %v432_v17 }
 0x110   :  { %394 = vmatmul.mubr.msk.f32.gmra.mxu1 %vm235_vm3, %v215_v61 }
 0x111   :  { %396 = vmatprep.mubr.msk.f32.mxu1 %vm433_vm2, %v432_v17 }
 0x114   :  { %397 = vmatmul.mubr.msk.f32.gmra.mxu1 %vm235_vm3, %v216_v62 }
 0x1cc   :  { %v311_v3 = vpop.f32.mrf.mxu1 }
 0x1cd   :  { %v312_v4 = vadd.f32 %v311_v3, %v223_v63 }
 0x1ce   :  { %v392_v6 = vpop.f32.mrf.mxu1 }
 0x1cf   :  { %v325_v8 = vmax.f32 %v312_v4, 0.0 }
 0x1d0   :  { %v316_v10 = vpop.f32.mrf.mxu1 }
 0x1d1   :  { %v328_v11 = vadd.f32 %v325_v8, %v169_v7  ;;  %v317_v12 = vadd.f32 %v316_v10, %v228_v0 }
 0x1d2   :  { %v395_v14 = vpop.f32.mrf.mxu1 }
 0x1d3   :  { %331 = vst [vmem:[#allocation2] sm:$0xff] %v328_v11  ;;  %v326_v16 = vmax.f32 %v317_v12, 0.0 }
 0x1d4   :  { %v321_v17 = vpop.f32.mrf.mxu1 }
 0x1d5   :  { %v329_v18 = vadd.f32 %v326_v16, %v174_v15  ;;  %v322_v19 = vadd.f32 %v321_v17, %v233_v1 }
 0x1d6   :  { %v398_v21 = vpop.f32.mrf.mxu1 }
 0x1d7   :  { %332 = vst [vmem:[#allocation2 + $0x8] sm:$0xff] %v329_v18  ;;  %v327_v23 = vmax.f32 %v322_v19, 0.0 }
 0x1d9   :  { %v330_v24 = vadd.f32 %v327_v23, %v179_v22 }
 0x1db   :  { %333 = vst [vmem:[#allocation2 + $0x10] sm:$0xff] %v330_v24 }
 0x1dc   :  { %420 = shalt.err (!%p417_p4)
}
 0x1dd   :  { %s435_s28 = smov 128   ;;  %s436_s29 = smov 8  }
 0x1de   :  { %345 = dma.vmem_to_hbm [thread:$0]  %s340_s26, 384, %s541_s5, [#allocation3], %s435_s28, %s435_s28, %s436_s29  }
 0x1df   :  { %429 = dma.done.wait [#allocation3], 384  }
 0x1e0   :  { %430 = vsyncadd [#allocation3], 4294966912 }
 0x1e1   :  { %349 = vsyncpa [#allocation3], 1 }

</bundles_post_ra>
